<compile_context>
chip_gen: v7x
topology: tpu7x:2x2x1
jax: 0.10.0
libtpu: 0.0.40
codegen_flags: <defaults>
</compile_context>

<pallas_src>
import jax
import jax.numpy as jnp
from jax.experimental import pallas as pl
from jax.experimental.pallas import tpu as pltpu


def critic_kernel(xT_ref, w1_ref, b1_ref, w2_ref, b2_ref, w3_ref, b3_ref, o_ref):
    """One batch tile. xT_ref: [in_dim, bt] (batch on lanes). Output o_ref: [1, bt]."""
    cdt = w1_ref.dtype  # MXU operand dtype (float32 or bfloat16); accumulation is f32.

    # Layer 1: [128, in_dim] @ [in_dim, bt] -> [128, bt]  (f32 accumulation)
    h1 = jnp.dot(w1_ref[...], xT_ref[...], preferred_element_type=jnp.float32)
    h1 = jnp.maximum(h1 + b1_ref[...].astype(jnp.float32), 0.0)

    # Layer 2: [64, 128] @ [128, bt] -> [64, bt]
    h2 = jnp.dot(w2_ref[...], h1.astype(cdt), preferred_element_type=jnp.float32)
    h2 = jnp.maximum(h2 + b2_ref[...].astype(jnp.float32), 0.0)

    # Layer 3 (out_features = 1): VPU multiply + sublane reduction instead of a
    # degenerate N=1 MXU matmul.  w3_ref is [64, 1] (column layout).  Result: [1, bt].
    out = jnp.sum(h2 * w3_ref[...].astype(jnp.float32), axis=0, keepdims=True)
    o_ref[...] = out + b3_ref[...].astype(jnp.float32)


def _round_up(x, m):
    return ((x + m - 1) // m) * m


def critic_forward(x, params, *, batch_tile=512, operand_dtype=jnp.float32):
    """x: [B, input_size].  params: PyTorch-layout weights w[i]:(out,in), b[i]:(out,1)."""
    B, in_dim = x.shape
    w1, b1, w2, b2, w3, b3 = (params[k] for k in ("w1", "b1", "w2", "b2", "w3", "b3"))
    h1d, h2d = w1.shape[0], w2.shape[0]  # 128, 64

    # Pick a lane-dense batch tile (multiple of 128) and pad the batch up to it.
    bt = _round_up(min(batch_tile, _round_up(max(B, 1), 128)), 128)
    B_pad = _round_up(B, bt)
    grid = (B_pad // bt,)

    xp = x.astype(operand_dtype)
    if B_pad != B:
        xp = jnp.pad(xp, ((0, B_pad - B), (0, 0)))
    xT = xp.T  # [in_dim, B_pad]: batch on the lane axis (layout plumbing in XLA).

    w1c = w1.astype(operand_dtype)
    w2c = w2.astype(operand_dtype)
    # FIX: kernel expects w3 as a [64, 1] column; PyTorch stores it as (1, 64).
    w3c = w3.astype(operand_dtype).reshape(h2d, 1)

    # Weights/biases: constant block index -> fetched once, stay VMEM-resident.
    rep = lambda shape: pl.BlockSpec(shape, lambda i: (0, 0))

    outT = pl.pallas_call(
        critic_kernel,
        out_shape=jax.ShapeDtypeStruct((1, B_pad), jnp.float32),
        grid_spec=pltpu.PrefetchScalarGridSpec(
            num_scalar_prefetch=0,
            grid=grid,
            in_specs=[
                pl.BlockSpec((in_dim, bt), lambda i: (0, i)),  # x^T tile
                rep((h1d, in_dim)), rep((h1d, 1)),             # layer 1
                rep((h2d, h1d)),    rep((h2d, 1)),             # layer 2
                rep((h2d, 1)),      rep((1, 1)),               # layer 3 (w3 column, b3)
            ],
            out_specs=pl.BlockSpec((1, bt), lambda i: (0, i)),  # lane-dense output slab
        ),
        compiler_params=pltpu.CompilerParams(
            dimension_semantics=("parallel",),       # batch axis shards across TCs (v7x)
            vmem_limit_bytes=32 * 1024 * 1024,
        ),
    )(xT, w1c, b1, w2c, b2, w3c, b3)

    # Back to the PyTorch output layout [B, 1].
    return outT[0, :B][:, None]


def init_critic_params(key, input_size, output_size=1):
    """nn.Linear-style init (uniform +-1/sqrt(fan_in)); PyTorch (out,in) weight layout.
    Note: the module's final layer is fixed to 1 output regardless of output_size."""
    sizes = [(input_size, 128), (128, 64), (64, 1)]
    params = {}
    for idx, (fan_in, fan_out) in enumerate(sizes, start=1):
        key, kw, kb = jax.random.split(key, 3)
        bound = 1.0 / (fan_in ** 0.5)
        params[f"w{idx}"] = jax.random.uniform(
            kw, (fan_out, fan_in), jnp.float32, -bound, bound)
        params[f"b{idx}"] = jax.random.uniform(
            kb, (fan_out, 1), jnp.float32, -bound, bound)
    return params


def critic_reference(x, params):
    h1 = jnp.maximum(x @ params["w1"].T + params["b1"][:, 0], 0.0)
    h2 = jnp.maximum(h1 @ params["w2"].T + params["b2"][:, 0], 0.0)
    return h2 @ params["w3"].T + params["b3"][:, 0]


if __name__ == "__main__":
    key = jax.random.PRNGKey(0)
    key, kx1, kx2, kx3 = jax.random.split(key, 4)

    input_size = 32  # e.g. concat(obs, actions) for the centralized critic
    params = init_critic_params(key, input_size)

    # Test 1: tiny batch (padded to one 128-wide lane tile), f32.
    x1 = jax.random.normal(kx1, (8, input_size), dtype=jnp.float32)
    o1 = jax.block_until_ready(critic_forward(x1, params))
    r1 = critic_reference(x1, params)
    assert o1.shape == (8, 1)
    assert jnp.allclose(o1, r1, atol=1e-4, rtol=1e-4), "f32 mismatch (tiny batch)"

    # Test 2: non-multiple batch, multi-tile grid (grid=(3,)), f32.
    x2 = jax.random.normal(kx2, (300, input_size), dtype=jnp.float32)
    o2 = jax.block_until_ready(critic_forward(x2, params, batch_tile=128))
    r2 = critic_reference(x2, params)
    assert o2.shape == (300, 1)
    assert jnp.allclose(o2, r2, atol=1e-4, rtol=1e-4), "f32 mismatch (multi-tile)"

    # Test 3: bf16 operands (v6e/v7x MXU path), f32 accumulation; loose tolerance.
    x3 = jax.random.normal(kx3, (256, input_size), dtype=jnp.float32)
    o3 = jax.block_until_ready(
        critic_forward(x3, params, operand_dtype=jnp.bfloat16))
    r3 = critic_reference(x3, params)
    assert o3.shape == (256, 1)
    assert jnp.allclose(o3, r3, atol=5e-2, rtol=5e-2), "bf16 mismatch"

    print("KERNEL_OK")
</pallas_src>

<mosaic_0001>
module attributes {stable_mosaic.version = 11 : i64} {
  func.func @critic_kernel(%arg0: i32, %arg1: memref<32x128xf32, #tpu.memory_space<vmem>>, %arg2: memref<128x32xf32, #tpu.memory_space<vmem>>, %arg3: memref<128x1xf32, #tpu.memory_space<vmem>>, %arg4: memref<64x128xf32, #tpu.memory_space<vmem>>, %arg5: memref<64x1xf32, #tpu.memory_space<vmem>>, %arg6: memref<64x1xf32, #tpu.memory_space<vmem>>, %arg7: memref<1x1xf32, #tpu.memory_space<vmem>>, %arg8: memref<1x128xf32, #tpu.memory_space<vmem>>) attributes {dimension_semantics = [#tpu.dimension_semantics<parallel>], iteration_bounds = array<i64: 1>, scalar_prefetch = 0 : i64, scratch_operands = 0 : i64, tpu.core_type = #tpu.core_type<tc>, window_params = [{transform_indices = @transform_0, window_bounds = array<i64: 32, 128>}, {pipeline_mode = #tpu.pipeline_mode<synchronous>, transform_indices = @transform_1, window_bounds = array<i64: 128, 32>}, {pipeline_mode = #tpu.pipeline_mode<synchronous>, transform_indices = @transform_2, window_bounds = array<i64: 128, 1>}, {pipeline_mode = #tpu.pipeline_mode<synchronous>, transform_indices = @transform_3, window_bounds = array<i64: 64, 128>}, {pipeline_mode = #tpu.pipeline_mode<synchronous>, transform_indices = @transform_4, window_bounds = array<i64: 64, 1>}, {pipeline_mode = #tpu.pipeline_mode<synchronous>, transform_indices = @transform_5, window_bounds = array<i64: 64, 1>}, {pipeline_mode = #tpu.pipeline_mode<synchronous>, transform_indices = @transform_6, window_bounds = array<i64: 1, 1>}, {transform_indices = @transform_7, window_bounds = array<i64: 1, 128>}]} {
    %c0 = arith.constant 0 : index
    %c0_0 = arith.constant 0 : index
    %0 = vector.load %arg2[%c0, %c0_0] : memref<128x32xf32, #tpu.memory_space<vmem>>, vector<128x32xf32>
    %c0_1 = arith.constant 0 : index
    %c0_2 = arith.constant 0 : index
    %1 = vector.load %arg1[%c0_1, %c0_2] : memref<32x128xf32, #tpu.memory_space<vmem>>, vector<32x128xf32>
    %cst = arith.constant dense<0.000000e+00> : vector<128x128xf32>
    %2 = tpu.matmul %0, %1, %cst {dimension_numbers = #tpu.dot_dimension_numbers<[1], [0], [0], [1], [0, 0, 1, 1], [], []>} : vector<128x32xf32>, vector<32x128xf32>, vector<128x128xf32> -> vector<128x128xf32>
    %c0_3 = arith.constant 0 : index
    %c0_4 = arith.constant 0 : index
    %3 = vector.load %arg3[%c0_3, %c0_4] : memref<128x1xf32, #tpu.memory_space<vmem>>, vector<128x1xf32>
    %4 = vector.broadcast %3 : vector<128x1xf32> to vector<128x128xf32>
    %5 = arith.addf %2, %4 : vector<128x128xf32>
    %cst_5 = arith.constant 0.000000e+00 : f32
    %6 = vector.broadcast %cst_5 : f32 to vector<128x128xf32>
    %7 = arith.maximumf %5, %6 : vector<128x128xf32>
    %c0_6 = arith.constant 0 : index
    %c0_7 = arith.constant 0 : index
    %8 = vector.load %arg4[%c0_6, %c0_7] : memref<64x128xf32, #tpu.memory_space<vmem>>, vector<64x128xf32>
    %cst_8 = arith.constant dense<0.000000e+00> : vector<64x128xf32>
    %9 = tpu.matmul %8, %7, %cst_8 {dimension_numbers = #tpu.dot_dimension_numbers<[1], [0], [0], [1], [0, 0, 1, 1], [], []>} : vector<64x128xf32>, vector<128x128xf32>, vector<64x128xf32> -> vector<64x128xf32>
    %c0_9 = arith.constant 0 : index
    %c0_10 = arith.constant 0 : index
    %10 = vector.load %arg5[%c0_9, %c0_10] : memref<64x1xf32, #tpu.memory_space<vmem>>, vector<64x1xf32>
    %11 = vector.broadcast %10 : vector<64x1xf32> to vector<64x128xf32>
    %12 = arith.addf %9, %11 : vector<64x128xf32>
    %cst_11 = arith.constant 0.000000e+00 : f32
    %13 = vector.broadcast %cst_11 : f32 to vector<64x128xf32>
    %14 = arith.maximumf %12, %13 : vector<64x128xf32>
    %c0_12 = arith.constant 0 : index
    %c0_13 = arith.constant 0 : index
    %15 = vector.load %arg6[%c0_12, %c0_13] : memref<64x1xf32, #tpu.memory_space<vmem>>, vector<64x1xf32>
    %16 = vector.broadcast %15 : vector<64x1xf32> to vector<64x128xf32>
    %17 = arith.mulf %14, %16 : vector<64x128xf32>
    %cst_14 = arith.constant dense<0.000000e+00> : vector<128xf32>
    %18 = vector.multi_reduction <add>, %17, %cst_14 [0] : vector<64x128xf32> to vector<128xf32>
    %19 = vector.shape_cast %18 : vector<128xf32> to vector<1x128xf32>
    %c0_15 = arith.constant 0 : index
    %c0_16 = arith.constant 0 : index
    %20 = vector.load %arg7[%c0_15, %c0_16] : memref<1x1xf32, #tpu.memory_space<vmem>>, vector<1x1xf32>
    %21 = vector.broadcast %20 : vector<1x1xf32> to vector<1x128xf32>
    %22 = arith.addf %19, %21 : vector<1x128xf32>
    %c0_17 = arith.constant 0 : index
    %c0_18 = arith.constant 0 : index
    %23 = vector.load %arg8[%c0_17, %c0_18] : memref<1x128xf32, #tpu.memory_space<vmem>>, vector<1x128xf32>
    tpu.vector_store %arg8[%c0_17, %c0_18], %22 {strides = array<i32>} : memref<1x128xf32, #tpu.memory_space<vmem>>, vector<1x128xf32>,
    return
  }
  func.func @transform_0(%arg0: i32) -> (i32, i32) {
    %c0_i32 = arith.constant 0 : i32
    %c0_i32_0 = arith.constant 0 : i32
    return %c0_i32, %arg0 : i32, i32
  }
  func.func @transform_1(%arg0: i32) -> (i32, i32) {
    %c0_i32 = arith.constant 0 : i32
    %c0_i32_0 = arith.constant 0 : i32
    %c0_i32_1 = arith.constant 0 : i32
    return %c0_i32, %c0_i32_0 : i32, i32
  }
  func.func @transform_2(%arg0: i32) -> (i32, i32) {
    %c0_i32 = arith.constant 0 : i32
    %c0_i32_0 = arith.constant 0 : i32
    %c0_i32_1 = arith.constant 0 : i32
    return %c0_i32, %c0_i32_0 : i32, i32
  }
  func.func @transform_3(%arg0: i32) -> (i32, i32) {
    %c0_i32 = arith.constant 0 : i32
    %c0_i32_0 = arith.constant 0 : i32
    %c0_i32_1 = arith.constant 0 : i32
    return %c0_i32, %c0_i32_0 : i32, i32
  }
  func.func @transform_4(%arg0: i32) -> (i32, i32) {
    %c0_i32 = arith.constant 0 : i32
    %c0_i32_0 = arith.constant 0 : i32
    %c0_i32_1 = arith.constant 0 : i32
    return %c0_i32, %c0_i32_0 : i32, i32
  }
  func.func @transform_5(%arg0: i32) -> (i32, i32) {
    %c0_i32 = arith.constant 0 : i32
    %c0_i32_0 = arith.constant 0 : i32
    %c0_i32_1 = arith.constant 0 : i32
    return %c0_i32, %c0_i32_0 : i32, i32
  }
  func.func @transform_6(%arg0: i32) -> (i32, i32) {
    %c0_i32 = arith.constant 0 : i32
    %c0_i32_0 = arith.constant 0 : i32
    %c0_i32_1 = arith.constant 0 : i32
    return %c0_i32, %c0_i32_0 : i32, i32
  }
  func.func @transform_7(%arg0: i32) -> (i32, i32) {
    %c0_i32 = arith.constant 0 : i32
    %c0_i32_0 = arith.constant 0 : i32
    return %c0_i32, %arg0 : i32, i32
  }
}

</mosaic_0001>

<bundles_post_ra>
// kernel: tpu_custom_call.1
= control target key start
LH: loop header
LB: loop body
LE: loop exit
PB: predicated region body
PF: predicated region fallthrough
CT: control target
= control target key end

     0   :  { %s1092_s0 = inlined_call_operand.vmem [shape: f32[32,128], index: 0, kind: input, shape index: {}]   ;;  %s1093_s1 = inlined_call_operand.vmem [shape: f32[128,32], index: 1, kind: input, shape index: {}]   ;;  %s1094_s2 = inlined_call_operand.vmem [shape: f32[128,1], index: 2, kind: input, shape index: {}]   ;;  %s1095_s3 = inlined_call_operand.vmem [shape: f32[64,128], index: 3, kind: input, shape index: {}]   ;;  %s1096_s4 = inlined_call_operand.vmem [shape: f32[64,1], index: 4, kind: input, shape index: {}]   ;;  %s1097_s5 = inlined_call_operand.vmem [shape: f32[64,1], index: 5, kind: input, shape index: {}]   ;;  %s1098_s6 = inlined_call_operand.<no memory space> [shape: f32[1,1], index: 6, kind: input, shape index: {}]   ;;  %s1099_s7 = inlined_call_operand.hbm [shape: f32[1,128], index: 7, kind: output, shape index: {}]  }
   0x1   :  { %v12_v0 = vstv %s1098_s6 }
   0x2   :  { %13 = vst [vmem:[#allocation2] sm:$0x1] %v12_v0 }
   0x3   :  { %v45_v1 = vld [vmem:[%s1092_s0] sm:$0xff]  ;;  %v46_v2 = vld [vmem:[%s1092_s0 + $0x8] sm:$0xff]  ;;  %v47_v3 = vld [vmem:[%s1092_s0 + $0x10] sm:$0xff]  ;;  %vm145_vm0 = vcmask 261120   ;;  %v839_v7 = vmov 0  }
   0x4   :  { %v755_v4 = vpack.c.bf16 %v46_v2, %v45_v1  ;;  %v48_v5 = vld [vmem:[%s1092_s0 + $0x18] sm:$0xff]  ;;  %v29_v6 = vld [vmem:[%s1093_s1] sm:$0xff]  ;;  %813 = vset.pattern.permute.xlu0 %v839_v7  ;;  %814 = vset.pattern.permute.xlu1 %v839_v7  ;;  %v50_v10 = vld [vmem:[%s1094_s2 + $0x8] sm:$0xff] }
   0x5   :  { %v759_v8 = vpack.c.bf16 %v48_v5, %v47_v3  ;;  %687 = vmatprep.mubr.msk.f32.mxu0 %vm145_vm0, %v29_v6  ;;  %v49_v9 = vld [vmem:[%s1094_s2] sm:$0xff]  ;;  %v51_v11 = vld [vmem:[%s1094_s2 + $0x10] sm:$0xff]  ;;  %v30_v12 = vld [vmem:[%s1093_s1 + $0x8] sm:$0xff] }
   0x6   :  { %756 = vmatprep.subr.bf16.mxu0 %v755_v4  ;;  %67 = vperm.xlu0 %813, %v49_v9   ;;  %v52_v13 = vld [vmem:[%s1094_s2 + $0x18] sm:$0xff]  ;;  %v31_v14 = vld [vmem:[%s1093_s1 + $0x10] sm:$0xff]  ;;  %v53_v15 = vld [vmem:[%s1094_s2 + $0x20] sm:$0xff] }
   0x7   :  { %758 = vmatpush3.bf16.msra.mxu0 %v755_v4  ;;  %77 = vperm.xlu1 %814, %v51_v11   ;;  %v32_v16 = vld [vmem:[%s1093_s1 + $0x18] sm:$0xff]  ;;  %v54_v17 = vld [vmem:[%s1094_s2 + $0x28] sm:$0xff]  ;;  %v33_v18 = vld [vmem:[%s1093_s1 + $0x20] sm:$0xff] }
   0x8   :  { %760 = vmatprep.subr.bf16.mxu0 %v759_v8  ;;  %v55_v19 = vld [vmem:[%s1094_s2 + $0x30] sm:$0xff]  ;;  %v34_v20 = vld [vmem:[%s1093_s1 + $0x28] sm:$0xff]  ;;  %v56_v21 = vld [vmem:[%s1094_s2 + $0x38] sm:$0xff] }
   0x9   :  { %v35_v22 = vld [vmem:[%s1093_s1 + $0x30] sm:$0xff] }
   0xa   :  { %72 = vperm.xlu0 %813, %v50_v10  }
   0xb   :  { %762 = vmatpush3.bf16.msra.mxu0 %v759_v8  ;;  %82 = vperm.xlu1 %814, %v52_v13  }
   0xe   :  { %688 = vmatmul.mubr.msk.f32.vlgmr.msra.gmra.mrb[0].mxu0 %vm145_vm0, %v30_v12  ;;  %87 = vperm.xlu0 %813, %v53_v15  }
   0xf   :  { %690 = vmatprep.mubr.msk.f32.mxu0 %vm145_vm0, %v31_v14  ;;  %92 = vperm.xlu1 %814, %v54_v17  }
  0x12   :  { %691 = vmatmul.mubr.msk.f32.gmra.mrb[2].mxu0 %vm145_vm0, %v32_v16  ;;  %97 = vperm.xlu0 %813, %v55_v19  }
  0x13   :  { %693 = vmatprep.mubr.msk.f32.mxu0 %vm145_vm0, %v33_v18 }
  0x14   :  { %14 = vsyncpa [#allocation4], 0  ;;  %v57_v23 = vld [vmem:[%s1094_s2 + $0x40] sm:$0xff]  ;;  %102 = vperm.xlu1 %814, %v56_v21   ;;  %v36_v24 = vld [vmem:[%s1093_s1 + $0x38] sm:$0xff] }
  0x15   :  { %v58_v25 = vld [vmem:[%s1094_s2 + $0x48] sm:$0xff]  ;;  %v37_v26 = vld [vmem:[%s1093_s1 + $0x40] sm:$0xff]  ;;  %v59_v27 = vld [vmem:[%s1094_s2 + $0x50] sm:$0xff] }
  0x16   :  { %694 = vmatmul.mubr.msk.f32.gmra.mrb[4].mxu0 %vm145_vm0, %v34_v20  ;;  %107 = vperm.xlu0 %813, %v57_v23   ;;  %v38_v28 = vld [vmem:[%s1093_s1 + $0x48] sm:$0xff]  ;;  %v60_v29 = vld [vmem:[%s1094_s2 + $0x58] sm:$0xff]  ;;  %v39_v30 = vld [vmem:[%s1093_s1 + $0x50] sm:$0xff] }
  0x17   :  { %696 = vmatprep.mubr.msk.f32.mxu0 %vm145_vm0, %v35_v22  ;;  %v61_v31 = vld [vmem:[%s1094_s2 + $0x60] sm:$0xff]  ;;  %v40_v32 = vld [vmem:[%s1093_s1 + $0x58] sm:$0xff]  ;;  %v62_v33 = vld [vmem:[%s1094_s2 + $0x68] sm:$0xff] }
  0x18   :  { %112 = vperm.xlu1 %814, %v58_v25   ;;  %v41_v34 = vld [vmem:[%s1093_s1 + $0x60] sm:$0xff]  ;;  %v63_v35 = vld [vmem:[%s1094_s2 + $0x70] sm:$0xff]  ;;  %v42_v36 = vld [vmem:[%s1093_s1 + $0x68] sm:$0xff] }
  0x19   :  { %v64_v37 = vld [vmem:[%s1094_s2 + $0x78] sm:$0xff]  ;;  %v43_v38 = vld [vmem:[%s1093_s1 + $0x70] sm:$0xff]  ;;  %v363_v39 = vld [vmem:[%s1096_s4] sm:$0xff] }
  0x1a   :  { %697 = vmatmul.mubr.msk.f32.gmra.mrb[6].mxu0 %vm145_vm0, %v36_v24  ;;  %117 = vperm.xlu0 %813, %v59_v27   ;;  %v44_v40 = vld [vmem:[%s1093_s1 + $0x78] sm:$0xff]  ;;  %v364_v41 = vld [vmem:[%s1096_s4 + $0x8] sm:$0xff]  ;;  %v365_v42 = vld [vmem:[%s1096_s4 + $0x10] sm:$0xff] }
  0x1b   :  { %699 = vmatprep.mubr.msk.f32.mxu0 %vm145_vm0, %v37_v26  ;;  %v366_v43 = vld [vmem:[%s1096_s4 + $0x18] sm:$0xff]  ;;  %v524_v44 = vld [vmem:[%s1097_s5] sm:$0xff]  ;;  %v525_v45 = vld [vmem:[%s1097_s5 + $0x8] sm:$0xff] }
  0x1c   :  { %122 = vperm.xlu1 %814, %v60_v29   ;;  %v367_v46 = vld [vmem:[%s1096_s4 + $0x20] sm:$0xff]  ;;  %v526_v47 = vld [vmem:[%s1097_s5 + $0x10] sm:$0xff]  ;;  %v368_v48 = vld [vmem:[%s1096_s4 + $0x28] sm:$0xff] }
  0x1d   :  { %v527_v49 = vld [vmem:[%s1097_s5 + $0x18] sm:$0xff]  ;;  %v369_v50 = vld [vmem:[%s1096_s4 + $0x30] sm:$0xff]  ;;  %v528_v51 = vld [vmem:[%s1097_s5 + $0x20] sm:$0xff] }
  0x1e   :  { %700 = vmatmul.mubr.msk.f32.gmra.mrb[8].mxu0 %vm145_vm0, %v38_v28  ;;  %127 = vperm.xlu0 %813, %v61_v31   ;;  %v370_v52 = vld [vmem:[%s1096_s4 + $0x38] sm:$0xff]  ;;  %v529_v53 = vld [vmem:[%s1097_s5 + $0x28] sm:$0xff]  ;;  %v530_v54 = vld [vmem:[%s1097_s5 + $0x30] sm:$0xff] }
  0x1f   :  { %702 = vmatprep.mubr.msk.f32.mxu0 %vm145_vm0, %v39_v30  ;;  %v531_v55 = vld [vmem:[%s1097_s5 + $0x38] sm:$0xff]  ;;  %v593_v56 = vld [vmem:[#allocation2] sm:$0x1]  ;;  %v357_v58 = vld [vmem:[%s1095_s3 + $0x10] sm:$0xff] }
  0x20   :  { %132 = vperm.xlu1 %814, %v62_v33   ;;  %v355_v57 = vld [vmem:[%s1095_s3] sm:$0xff]  ;;  %746 = vmatprep.mubr.f32.mxu1 %v357_v58 }
  0x22   :  { %703 = vmatmul.mubr.msk.f32.gmra.mrb[10].mxu0 %vm145_vm0, %v40_v32  ;;  %137 = vperm.xlu0 %813, %v63_v35  }
  0x23   :  { %705 = vmatprep.mubr.msk.f32.mxu0 %vm145_vm0, %v41_v34 }
  0x24   :  { %142 = vperm.xlu1 %814, %v64_v37  }
  0x26   :  { %706 = vmatmul.mubr.msk.f32.gmra.mrb[12].mxu0 %vm145_vm0, %v42_v36  ;;  %373 = vperm.xlu0 %813, %v363_v39  }
  0x27   :  { %708 = vmatprep.mubr.msk.f32.mxu0 %vm145_vm0, %v43_v38 }
  0x28   :  { %378 = vperm.xlu1 %814, %v364_v41  }
  0x2a   :  { %709 = vmatmul.mubr.msk.f32.gmra.mrb[14].mxu0 %vm145_vm0, %v44_v40  ;;  %383 = vperm.xlu0 %813, %v365_v42  }
  0x2b   :  { %743 = vmatprep.mubr.f32.mxu0 %v355_v57 }
  0x2c   :  { %388 = vperm.xlu1 %814, %v366_v43  }
  0x2e   :  { %534 = vperm.xlu0 %813, %v524_v44  }
  0x30   :  { %539 = vperm.xlu1 %814, %v525_v45  }
  0x32   :  { %393 = vperm.xlu0 %813, %v367_v46  }
  0x34   :  { %544 = vperm.xlu1 %814, %v526_v47  }
  0x36   :  { %398 = vperm.xlu0 %813, %v368_v48  }
  0x38   :  { %549 = vperm.xlu1 %814, %v527_v49  }
  0x3a   :  { %403 = vperm.xlu0 %813, %v369_v50  }
  0x3c   :  { %554 = vperm.xlu1 %814, %v528_v51  }
  0x3e   :  { %408 = vperm.xlu0 %813, %v370_v52  }
  0x40   :  { %559 = vperm.xlu1 %814, %v529_v53  }
  0x42   :  { %564 = vperm.xlu0 %813, %v530_v54  }
  0x44   :  { %569 = vperm.xlu1 %814, %v531_v55  }
  0x46   :  { %596 = vperm.xlu0 %813, %v593_v56  }
  0x85   :  { %v68_v60 = vpop.permute.xlu0 %67 }
  0x86   :  { %v78_v59 = vpop.permute.xlu1 %77 }
  0x89   :  { %v73_v62 = vpop.permute.xlu0 %72 }
  0x8a   :  { %v83_v61 = vpop.permute.xlu1 %82 }
  0x8d   :  { %v88_v0 = vpop.permute.xlu0 %87 }
  0x8e   :  { %v93_v63 = vpop.permute.xlu1 %92 }
  0x91   :  { %v98_v9 = vpop.permute.xlu0 %97 }
  0x93   :  { %v103_v6 = vpop.permute.xlu1 %102 }
  0x95   :  { %v108_v22 = vpop.permute.xlu0 %107 }
  0x97   :  { %v113_v19 = vpop.permute.xlu1 %112 }
  0x99   :  { %v118_v34 = vpop.permute.xlu0 %117 }
  0x9b   :  { %v123_v31 = vpop.permute.xlu1 %122 }
  0x9d   :  { %v128_v47 = vpop.permute.xlu0 %127 }
  0x9f   :  { %v133_v44 = vpop.permute.xlu1 %132 }
  0xa3   :  { %v143_v56 = vpop.permute.xlu1 %142 }
  0xe1   :  { %v689_v1 = vpop.f32.mrb[0].mxu0 }
  0xe2   :  { %v266_v2 = vadd.f32 %v689_v1, %v73_v62  ;;  %v260_v3 = vpop.f32.mrb[1].mxu0 }
  0xe3   :  { %v261_v4 = vadd.f32 %v260_v3, %v68_v60  ;;  %v356_v3 = vld [vmem:[%s1095_s3 + $0x8] sm:$0xff] }
  0xe4   :  { %v340_v5 = vmax.f32 %v266_v2, 0.0 }
  0xe5   :  { %v339_v7 = vmax.f32 %v261_v4, 0.0  ;;  %v692_v8 = vpop.f32.mrb[2].mxu0  ;;  %v358_v4 = vld [vmem:[%s1095_s3 + $0x18] sm:$0xff] }
  0xe6   :  { %v276_v10 = vadd.f32 %v692_v8, %v83_v61  ;;  %v270_v11 = vpop.f32.mrb[3].mxu0  ;;  %v362_v8 = vld [vmem:[%s1095_s3 + $0x38] sm:$0xff] }
  0xe7   :  { %v763_v12 = vpack.c.bf16 %v340_v5, %v339_v7  ;;  %v271_v13 = vadd.f32 %v270_v11, %v78_v59  ;;  %v138_v59 = vpop.permute.xlu0 %137  ;;  %v359_v5 = vld [vmem:[%s1095_s3 + $0x20] sm:$0xff]  ;;  %v361_v7 = vld [vmem:[%s1095_s3 + $0x30] sm:$0xff] }
  0xe8   :  { %v342_v14 = vmax.f32 %v276_v10, 0.0  ;;  %v379_v10 = vpop.permute.xlu1 %378 }
  0xe9   :  { %v341_v15 = vmax.f32 %v271_v13, 0.0  ;;  %v695_v16 = vpop.f32.mrb[4].mxu0  ;;  %764 = vmatprep.subr.bf16.mxu0 %v763_v12  ;;  %795 = vmatprep.subr.bf16.mxu1 %v763_v12 }
  0xea   :  { %v286_v17 = vadd.f32 %v695_v16, %v93_v63  ;;  %v280_v18 = vpop.f32.mrb[5].mxu0  ;;  %766 = vmatpush3.bf16.msra.mxu0 %v763_v12  ;;  %803 = vmatpush3.bf16.msra.mxu1 %v763_v12 }
  0xeb   :  { %v767_v20 = vpack.c.bf16 %v342_v14, %v341_v15  ;;  %v281_v21 = vadd.f32 %v280_v18, %v88_v0 }
  0xec   :  { %v344_v23 = vmax.f32 %v286_v17, 0.0  ;;  %v389_v12 = vpop.permute.xlu1 %388 }
  0xed   :  { %v343_v24 = vmax.f32 %v281_v21, 0.0  ;;  %v698_v25 = vpop.f32.mrb[6].mxu0  ;;  %768 = vmatprep.subr.bf16.mxu0 %v767_v20  ;;  %796 = vmatprep.subr.bf16.mxu1 %v767_v20 }
  0xee   :  { %v296_v26 = vadd.f32 %v698_v25, %v103_v6  ;;  %v290_v27 = vpop.f32.mrb[7].mxu0  ;;  %770 = vmatpush3.bf16.msra.mxu0 %v767_v20  ;;  %804 = vmatpush3.bf16.msra.mxu1 %v767_v20  ;;  %v360_v6 = vld [vmem:[%s1095_s3 + $0x28] sm:$0xff]  ;;  %s840_s3 = smov [#allocation3]  }
  0xef   :  { %v771_v28 = vpack.c.bf16 %v344_v23, %v343_v24  ;;  %v291_v29 = vadd.f32 %v290_v27, %v98_v9  ;;  %v374_v9 = vpop.permute.xlu0 %373  ;;  %s611_s15 = sshll.u32 %s840_s3, 4  ;;  %s612_s15 = int_to_ptr.vmem [resolvable:$true] %s611_s15 }
  0xf0   :  { %v346_v30 = vmax.f32 %v296_v26, 0.0  ;;  %v540_v14 = vpop.permute.xlu1 %539  ;;  %s815_s16 = scalar_lea.vmem %s612_s15, 16  ;;  %s819_s17 = scalar_lea.vmem %s612_s15, 32 }
  0xf1   :  { %v345_v32 = vmax.f32 %v291_v29, 0.0  ;;  %v701_v33 = vpop.f32.mrb[8].mxu0  ;;  %772 = vmatprep.subr.bf16.mxu0 %v771_v28  ;;  %797 = vmatprep.subr.bf16.mxu1 %v771_v28  ;;  %p816_p0 = scmp.ne.s32.totalorder %s612_s15, %s815_s16  ;;  %p820_p1 = scmp.lt.s32.totalorder %s612_s15, %s612_s15 }
  0xf2   :  { %v306_v35 = vadd.f32 %v701_v33, %v113_v19  ;;  %v300_v36 = vpop.f32.mrb[9].mxu0  ;;  %774 = vmatpush3.bf16.msra.mxu0 %v771_v28  ;;  %805 = vmatpush3.bf16.msra.mxu1 %v771_v28  ;;  %p821_p2 = scmp.lt.s32.totalorder %s819_s17, %s815_s16 }
  0xf3   :  { %v775_v37 = vpack.c.bf16 %v346_v30, %v345_v32  ;;  %v301_v38 = vadd.f32 %v300_v36, %v108_v22  ;;  %v384_v11 = vpop.permute.xlu0 %383 }
  0xf4   :  { %v348_v39 = vmax.f32 %v306_v35, 0.0  ;;  %v545_v16 = vpop.permute.xlu1 %544  ;;  %p822_p3 = por %p821_p2, %p820_p1 }
  0xf5   :  { %v347_v40 = vmax.f32 %v301_v38, 0.0  ;;  %v704_v41 = vpop.f32.mrb[10].mxu0  ;;  %776 = vmatprep.subr.bf16.mxu0 %v775_v37  ;;  %798 = vmatprep.subr.bf16.mxu1 %v775_v37 }
  0xf6   :  { %v316_v42 = vadd.f32 %v704_v41, %v123_v31  ;;  %v310_v43 = vpop.f32.mrb[11].mxu0  ;;  %778 = vmatpush3.bf16.msra.mxu0 %v775_v37  ;;  %806 = vmatpush3.bf16.msra.mxu1 %v775_v37  ;;  %p823_p4 = pnand %p822_p3, %p816_p0 }
  0xf7   :  { %v779_v45 = vpack.c.bf16 %v348_v39, %v347_v40  ;;  %v311_v46 = vadd.f32 %v310_v43, %v118_v34  ;;  %v535_v13 = vpop.permute.xlu0 %534 }
  0xf8   :  { %v350_v48 = vmax.f32 %v316_v42, 0.0  ;;  %v550_v18 = vpop.permute.xlu1 %549 }
  0xf9   :  { %v349_v49 = vmax.f32 %v311_v46, 0.0  ;;  %v707_v50 = vpop.f32.mrb[12].mxu0  ;;  %780 = vmatprep.subr.bf16.mxu0 %v779_v45  ;;  %799 = vmatprep.subr.bf16.mxu1 %v779_v45 }
  0xfa   :  { %v326_v51 = vadd.f32 %v707_v50, %v133_v44  ;;  %v320_v52 = vpop.f32.mrb[13].mxu0  ;;  %782 = vmatpush3.bf16.msra.mxu0 %v779_v45  ;;  %807 = vmatpush3.bf16.msra.mxu1 %v779_v45 }
  0xfb   :  { %v783_v53 = vpack.c.bf16 %v350_v48, %v349_v49  ;;  %v321_v54 = vadd.f32 %v320_v52, %v128_v47  ;;  %v394_v15 = vpop.permute.xlu0 %393 }
  0xfc   :  { %v352_v55 = vmax.f32 %v326_v51, 0.0  ;;  %v555_v32 = vpop.permute.xlu1 %554 }
  0xfd   :  { %v351_v57 = vmax.f32 %v321_v54, 0.0  ;;  %v710_v58 = vpop.f32.mrb[14].mxu0  ;;  %784 = vmatprep.subr.bf16.mxu0 %v783_v53  ;;  %800 = vmatprep.subr.bf16.mxu1 %v783_v53 }
  0xfe   :  { %v336_v60 = vadd.f32 %v710_v58, %v143_v56  ;;  %v330_v61 = vpop.f32.mrb[15].mxu0  ;;  %786 = vmatpush3.bf16.msra.mxu0 %v783_v53  ;;  %808 = vmatpush3.bf16.msra.mxu1 %v783_v53 }
  0xff   :  { %v787_v62 = vpack.c.bf16 %v352_v55, %v351_v57  ;;  %v331_v63 = vadd.f32 %v330_v61, %v138_v59  ;;  %v399_v17 = vpop.permute.xlu0 %398 }
 0x100   :  { %v354_v0 = vmax.f32 %v336_v60, 0.0  ;;  %v560_v50 = vpop.permute.xlu1 %559 }
 0x101   :  { %v353_v1 = vmax.f32 %v331_v63, 0.0  ;;  %788 = vmatprep.subr.bf16.mxu0 %v787_v62  ;;  %801 = vmatprep.subr.bf16.mxu1 %v787_v62  ;;  %v599_v63 = vlaneseq }
 0x102   :  { %790 = vmatpush3.bf16.msra.mxu0 %v787_v62  ;;  %809 = vmatpush3.bf16.msra.mxu1 %v787_v62 }
 0x103   :  { %v791_v2 = vpack.c.bf16 %v354_v0, %v353_v1  ;;  %v404_v27 = vpop.permute.xlu0 %403 }
 0x104   :  { %v570_v60 = vpop.permute.xlu1 %569 }
 0x105   :  { %792 = vmatprep.subr.bf16.mxu0 %v791_v2  ;;  %802 = vmatprep.subr.bf16.mxu1 %v791_v2 }
 0x106   :  { %794 = vmatpush3.bf16.msra.mxu0 %v791_v2  ;;  %810 = vmatpush3.bf16.msra.mxu1 %v791_v2  ;;  %v600_v2 = vshrl.u32 %v599_v63, 7 }
 0x107   :  { %v409_v43 = vpop.permute.xlu0 %408 }
 0x109   :  { %744 = vmatmul.mubr.f32.vlgmr.msra.gmra.mrb[16].mxu0 %v356_v3  ;;  %747 = vmatmul.mubr.f32.vlgmr.msra.gmra.mrb[0].mxu1 %v358_v4 }
 0x10a   :  { %749 = vmatprep.mubr.f32.mxu1 %v359_v5  ;;  %v601_v5 = vsub.s32 0, %v600_v2 }
 0x10b   :  { %v565_v57 = vpop.permute.xlu0 %564 }
 0x10d   :  { %750 = vmatmul.mubr.f32.gmra.mrb[2].mxu1 %v360_v6 }
 0x10e   :  { %752 = vmatprep.mubr.f32.mxu1 %v361_v7 }
 0x10f   :  { %v597_v7 = vpop.permute.xlu0 %596 }
 0x111   :  { %753 = vmatmul.mubr.f32.gmra.mrb[4].mxu1 %v362_v8 }
 0x1dc   :  { %v745_v19 = vpop.f32.mrb[16].mxu0  ;;  %v748_v20 = vpop.f32.mrb[0].mxu1 }
 0x1dd   :  { %v483_v21 = vadd.f32 %v745_v19, %v379_v10  ;;  %v493_v22 = vadd.f32 %v748_v20, %v389_v12  ;;  %v477_v23 = vpop.f32.mrb[17].mxu0  ;;  %v487_v24 = vpop.f32.mrb[1].mxu1 }
 0x1de   :  { %v478_v25 = vadd.f32 %v477_v23, %v374_v9  ;;  %v488_v26 = vadd.f32 %v487_v24, %v384_v11  ;;  %v602_v9 = vrot.slane %v597_v7, %v601_v5 }
 0x1df   :  { %v517_v28 = vmax.f32 %v483_v21, 0.0  ;;  %v519_v34 = vmax.f32 %v493_v22, 0.0 }
 0x1e0   :  { %v516_v29 = vmax.f32 %v478_v25, 0.0  ;;  %v518_v30 = vmax.f32 %v488_v26, 0.0  ;;  %v751_v31 = vpop.f32.mrb[2].mxu1 }
 0x1e1   :  { %v573_v33 = vmul.f32 %v540_v14, %v517_v28  ;;  %v497_v35 = vpop.f32.mrb[3].mxu1  ;;  %v503_v37 = vadd.f32 %v751_v31, %v399_v17  ;;  %v575_v44 = vmul.f32 %v550_v18, %v519_v34 }
 0x1e2   :  { %v572_v36 = vmul.f32 %v535_v13, %v516_v29  ;;  %v498_v38 = vadd.f32 %v497_v35, %v394_v15  ;;  %v574_v40 = vmul.f32 %v545_v16, %v518_v30 }
 0x1e3   :  { %v521_v47 = vmax.f32 %v503_v37, 0.0 }
 0x1e4   :  { %v580_v39 = vadd.f32 %v573_v33, %v572_v36  ;;  %v520_v41 = vmax.f32 %v498_v38, 0.0  ;;  %v754_v42 = vpop.f32.mrb[4].mxu1 }
 0x1e5   :  { %v507_v45 = vpop.f32.mrb[5].mxu1  ;;  %v513_v48 = vadd.f32 %v754_v42, %v409_v43  ;;  %v577_v54 = vmul.f32 %v560_v50, %v521_v47 }
 0x1e6   :  { %v581_v46 = vadd.f32 %v580_v39, %v574_v40  ;;  %v508_v49 = vadd.f32 %v507_v45, %v404_v27  ;;  %v576_v51 = vmul.f32 %v555_v32, %v520_v41 }
 0x1e7   :  { %v523_v56 = vmax.f32 %v513_v48, 0.0 }
 0x1e8   :  { %v582_v52 = vadd.f32 %v581_v46, %v575_v44  ;;  %v522_v53 = vmax.f32 %v508_v49, 0.0 }
 0x1e9   :  { %v579_v61 = vmul.f32 %v570_v60, %v523_v56 }
 0x1ea   :  { %v583_v55 = vadd.f32 %v582_v52, %v576_v51  ;;  %v578_v58 = vmul.f32 %v565_v57, %v522_v53 }
 0x1ec   :  { %v584_v59 = vadd.f32 %v583_v55, %v577_v54 }
 0x1ee   :  { %v585_v62 = vadd.f32 %v584_v59, %v578_v58 }
 0x1f0   :  { %v586_v0 = vadd.f32 %v585_v62, %v579_v61 }
 0x1f2   :  { %v587_v1 = vrot.slane %v586_v0, 4 }
 0x1f4   :  { %v588_v3 = vadd.f32 %v587_v1, %v586_v0 }
 0x1f6   :  { %v589_v4 = vrot.slane %v588_v3, 2 }
 0x1f8   :  { %v590_v6 = vadd.f32 %v589_v4, %v588_v3 }
 0x1fa   :  { %v591_v8 = vrot.slane %v590_v6, 1 }
 0x1fc   :  { %v592_v10 = vadd.f32 %v591_v8, %v590_v6 }
 0x1fe   :  { %v603_v11 = vadd.f32 %v602_v9, %v592_v10 }
 0x200   :  { %604 = vst [vmem:[#allocation3] sm:$0x1] %v603_v11 }
 0x201   :  { %826 = shalt.err (!%p823_p4)
}
 0x202   :  { %s827_s20 = scalar_lea.hbm %s1099_s7, 16 }
 0x203   :  { %p828_p5 = scmp.ne.s32.totalorder %s1099_s7, %s827_s20  ;;  %p831_p6 = scmp.lt.u32.totalorder %s827_s20, %s1099_s7 }
 0x205   :  { %p833_p7 = pnand %p831_p6, %p828_p5 }
 0x207   :  { %836 = shalt.err (!%p833_p7)
}
 0x208   :  { %614 = dma.vmem_to_hbm [thread:$0]  %s612_s15, 16, %s1099_s7, [#allocation4]  }
 0x209   :  { %837 = dma.done.wait [#allocation4], 16  }
 0x20a   :  { %838 = vsyncadd [#allocation4], 4294967280 }
 0x20b   :  { %618 = vsyncpa [#allocation4], 1 }

</bundles_post_ra>
